<compile_context>
chip_gen: v5e
topology: v5e:2x2
jax: 0.10.0
libtpu: 0.0.40
codegen_flags: <defaults>
</compile_context>

<pallas_src>
import jax
import jax.numpy as jnp
from jax.experimental import pallas as pl
from jax.experimental.pallas import tpu as pltpu

EPS = 1e-5  # torch.nn.InstanceNorm2d default


def _round_up(v, m):
    return (v + m - 1) // m * m


def _make_resblock_kernel(H, W, Cp):
    HW = H * W

    # Static tap metadata shared by both convs: (tap_index, lane_roll, mask_row).
    taps = []
    mrow = 0
    for kh in range(3):
        for kw in range(3):
            ddh, ddw = kh - 1, kw - 1
            delta = ddh * W + ddw                  # flat source offset
            if delta == 0:
                taps.append((kh * 3 + kw, None, None))
            else:
                taps.append((kh * 3 + kw, (-delta) % HW, mrow))
                mrow += 1

    def kernel(x_ref, m_ref, w1_ref, b1_ref, w2_ref, b2_ref, o_ref):
        x = x_ref[...].astype(jnp.float32)          # (Cp, HW) -- one sample
        masks = m_ref[...]                          # (8, HW) 0/1 border masks

        def conv3x3(h, w_ref, b_ref):
            # 9 per-tap accumulated MXU matmuls; no im2col slab materialized.
            acc = None
            for t, shift, mr in taps:
                wt = w_ref[t * Cp:(t + 1) * Cp, :].astype(jnp.float32)  # (Cp, Cp)
                if shift is None:
                    tap = h
                else:
                    tap = pltpu.roll(h, shift, axis=1) * masks[mr:mr + 1, :]
                y = jnp.dot(wt, tap, preferred_element_type=jnp.float32)
                acc = y if acc is None else acc + y
            return acc + b_ref[...].astype(jnp.float32)     # (Cp,1) broadcasts

        def instance_norm(h):
            # Single pass: sum and sum-of-squares; var = E[h^2] - mean^2.
            inv_hw = jnp.float32(1.0 / HW)
            mean = jnp.sum(h, axis=1, keepdims=True) * inv_hw
            ex2 = jnp.sum(h * h, axis=1, keepdims=True) * inv_hw
            var = ex2 - mean * mean
            return (h - mean) * jax.lax.rsqrt(var + EPS)

        h = conv3x3(x, w1_ref, b1_ref)
        h = jnp.maximum(instance_norm(h), 0.0)      # ReLU
        h = conv3x3(h, w2_ref, b2_ref)
        h = instance_norm(h)
        o_ref[...] = (h + x).astype(o_ref.dtype)    # residual add

    return kernel


def _border_masks(H, W):
    # One (8, HW) f32 mask block (the 8 non-center taps), built once on host/XLA.
    HW = H * W
    pos = jnp.arange(HW, dtype=jnp.int32)
    row = pos // W
    col = pos % W
    rows = []
    for kh in range(3):
        for kw in range(3):
            ddh, ddw = kh - 1, kw - 1
            if ddh == 0 and ddw == 0:
                continue
            valid = ((row + ddh >= 0) & (row + ddh < H) &
                     (col + ddw >= 0) & (col + ddw < W))
            rows.append(valid.astype(jnp.float32))
    return jnp.stack(rows, axis=0)                  # (8, HW)


def _prep_w(w, Cp):
    # (Cout, Cin, 3, 3) -> (9*Cp, Cp): rows [t*Cp:(t+1)*Cp] hold W_t[co, ci]
    # for tap t = kh*3 + kw.  Padded rows/cols are zero, so padded channels
    # stay identically zero through the whole block.
    co, ci = w.shape[0], w.shape[1]
    wm = jnp.transpose(w, (2, 3, 0, 1)).astype(jnp.float32)   # (3,3,co,ci)
    wm = wm.reshape(9, co, ci)
    wm = jnp.pad(wm, ((0, 0), (0, Cp - co), (0, Cp - ci)))
    return wm.reshape(9 * Cp, Cp)


def _prep_b(b, Cp):
    return jnp.pad(b.astype(jnp.float32), (0, Cp - b.shape[0])).reshape(Cp, 1)


def resblock_pallas_work(x_work, masks, w1m, b1c, w2m, b2c, *, N, H, W, Cp):
    """ResBlock on the working layout (Cp, N*H*W). grid=(N,), parallel samples."""
    HW = H * W
    kernel = _make_resblock_kernel(H, W, Cp)
    return pl.pallas_call(
        kernel,
        out_shape=jax.ShapeDtypeStruct((Cp, N * HW), x_work.dtype),
        grid_spec=pltpu.PrefetchScalarGridSpec(
            num_scalar_prefetch=0,
            grid=(N,),
            in_specs=[
                pl.BlockSpec((Cp, HW), lambda n: (0, n)),       # this sample
                pl.BlockSpec((8, HW), lambda n: (0, 0)),        # border masks
                pl.BlockSpec((9 * Cp, Cp), lambda n: (0, 0)),   # conv1 weights
                pl.BlockSpec((Cp, 1), lambda n: (0, 0)),        # conv1 bias
                pl.BlockSpec((9 * Cp, Cp), lambda n: (0, 0)),   # conv2 weights
                pl.BlockSpec((Cp, 1), lambda n: (0, 0)),        # conv2 bias
            ],
            out_specs=pl.BlockSpec((Cp, HW), lambda n: (0, n)),
        ),
        compiler_params=pltpu.CompilerParams(
            dimension_semantics=("parallel",)),
    )(x_work, masks, w1m, b1c, w2m, b2c)


def resblock_pallas(x_nchw, w1_oihw, b1, w2_oihw, b2):
    """x: (N, C, H, W); w: (Cout, Cin, 3, 3) PyTorch layout; b: (Cout,)."""
    N, C, H, W = x_nchw.shape
    Cout = w1_oihw.shape[0]
    assert Cout == C, "residual add requires in_ch == out_ch"
    Cp = _round_up(C, 8)                 # pad channels to the f32 sublane tile
    HW = H * W

    # Activations: NCHW -> (Cp, N*H*W): channels in sublanes, space in lanes;
    # sample n occupies lanes [n*HW, (n+1)*HW).
    x_work = jnp.transpose(x_nchw, (1, 0, 2, 3)).reshape(C, N * HW)
    x_work = jnp.pad(x_work, ((0, Cp - C), (0, 0)))

    masks = _border_masks(H, W)
    w1m, w2m = _prep_w(w1_oihw, Cp), _prep_w(w2_oihw, Cp)
    b1c, b2c = _prep_b(b1, Cp), _prep_b(b2, Cp)

    out_work = resblock_pallas_work(x_work, masks, w1m, b1c, w2m, b2c,
                                    N=N, H=H, W=W, Cp=Cp)

    # (Cp, N*H*W) -> (N, C, H, W)
    return jnp.transpose(out_work[:C].reshape(C, N, H, W), (1, 0, 2, 3))


def resblock_ref(x, w1, b1, w2, b2):
    # Pure-JAX NCHW reference for correctness checking.
    def conv(inp, w, b):
        out = jax.lax.conv_general_dilated(
            inp, w, window_strides=(1, 1), padding=((1, 1), (1, 1)),
            dimension_numbers=("NCHW", "OIHW", "NCHW"))
        return out + b.reshape(1, -1, 1, 1)

    def inorm(h):
        mean = jnp.mean(h, axis=(2, 3), keepdims=True)
        var = jnp.mean((h - mean) ** 2, axis=(2, 3), keepdims=True)
        return (h - mean) * jax.lax.rsqrt(var + EPS)

    h = conv(x, w1, b1)
    h = jnp.maximum(inorm(h), 0.0)
    h = conv(h, w2, b2)
    h = inorm(h)
    return h + x


def xavier_uniform_oihw(key, cout, cin, kh, kw, gain=1.0):
    fan_in = cin * kh * kw
    fan_out = cout * kh * kw
    bound = gain * jnp.sqrt(6.0 / (fan_in + fan_out))
    return jax.random.uniform(key, (cout, cin, kh, kw), jnp.float32, -bound, bound)


def conv_bias_init(key, cin, kh, kw, cout):
    # PyTorch Conv2d default bias init: U(-1/sqrt(fan_in), 1/sqrt(fan_in))
    bound = 1.0 / jnp.sqrt(cin * kh * kw)
    return jax.random.uniform(key, (cout,), jnp.float32, -bound, bound)


if __name__ == "__main__":
    N, C, H, W = 2, 4, 16, 16  # in_ch == out_ch == 4

    key = jax.random.PRNGKey(0)
    kx, kw1, kb1, kw2, kb2 = jax.random.split(key, 5)

    x = jax.random.normal(kx, (N, C, H, W), jnp.float32)     # PyTorch-style NCHW
    w1 = xavier_uniform_oihw(kw1, C, C, 3, 3)                # gain('linear') == 1.0
    b1 = conv_bias_init(kb1, C, 3, 3, C)
    w2 = xavier_uniform_oihw(kw2, C, C, 3, 3)
    b2 = conv_bias_init(kb2, C, 3, 3, C)

    out = resblock_pallas(x, w1, b1, w2, b2)
    out = jax.block_until_ready(out)

    ref = resblock_ref(x, w1, b1, w2, b2)
    assert out.shape == (N, C, H, W)
    max_err = float(jnp.max(jnp.abs(out - ref)))
    assert jnp.allclose(out, ref, atol=5e-4, rtol=5e-4), max_err

    print("KERNEL_OK")
</pallas_src>

<mosaic_0001>
module attributes {stable_mosaic.version = 11 : i64} {
  func.func @kernel(%arg0: i32, %arg1: memref<8x256xf32, #tpu.memory_space<vmem>>, %arg2: memref<8x256xf32, #tpu.memory_space<vmem>>, %arg3: memref<72x8xf32, #tpu.memory_space<vmem>>, %arg4: memref<8x1xf32, #tpu.memory_space<vmem>>, %arg5: memref<72x8xf32, #tpu.memory_space<vmem>>, %arg6: memref<8x1xf32, #tpu.memory_space<vmem>>, %arg7: memref<8x256xf32, #tpu.memory_space<vmem>>) attributes {dimension_semantics = [#tpu.dimension_semantics<parallel>], iteration_bounds = array<i64: 2>, scalar_prefetch = 0 : i64, scratch_operands = 0 : i64, tpu.core_type = #tpu.core_type<tc>, window_params = [{transform_indices = @transform_0, window_bounds = array<i64: 8, 256>}, {pipeline_mode = #tpu.pipeline_mode<synchronous>, transform_indices = @transform_1, window_bounds = array<i64: 8, 256>}, {pipeline_mode = #tpu.pipeline_mode<synchronous>, transform_indices = @transform_2, window_bounds = array<i64: 72, 8>}, {pipeline_mode = #tpu.pipeline_mode<synchronous>, transform_indices = @transform_3, window_bounds = array<i64: 8, 1>}, {pipeline_mode = #tpu.pipeline_mode<synchronous>, transform_indices = @transform_4, window_bounds = array<i64: 72, 8>}, {pipeline_mode = #tpu.pipeline_mode<synchronous>, transform_indices = @transform_5, window_bounds = array<i64: 8, 1>}, {transform_indices = @transform_6, window_bounds = array<i64: 8, 256>}]} {
    %c0 = arith.constant 0 : index
    %c0_0 = arith.constant 0 : index
    %0 = vector.load %arg1[%c0, %c0_0] : memref<8x256xf32, #tpu.memory_space<vmem>>, vector<8x256xf32>
    %c0_1 = arith.constant 0 : index
    %c0_2 = arith.constant 0 : index
    %1 = vector.load %arg2[%c0_1, %c0_2] : memref<8x256xf32, #tpu.memory_space<vmem>>, vector<8x256xf32>
    %c0_3 = arith.constant 0 : index
    %c0_4 = arith.constant 0 : index
    %2 = vector.load %arg3[%c0_3, %c0_4] : memref<72x8xf32, #tpu.memory_space<vmem>>, vector<8x8xf32>
    %c17_i32 = arith.constant 17 : i32
    %3 = tpu.dynamic_rotate %0 by %c17_i32 dim 1 : vector<8x256xf32>, i32 -> vector<8x256xf32>
    %4 = vector.extract_strided_slice %1 {offsets = [0, 0], sizes = [1, 256], strides = [1, 1]} : vector<8x256xf32> to vector<1x256xf32>
    %5 = vector.broadcast %4 : vector<1x256xf32> to vector<8x256xf32>
    %6 = arith.mulf %3, %5 : vector<8x256xf32>
    %cst = arith.constant dense<0.000000e+00> : vector<8x256xf32>
    %7 = tpu.matmul %2, %6, %cst {dimension_numbers = #tpu.dot_dimension_numbers<[1], [0], [0], [1], [0, 0, 1, 1], [], []>} : vector<8x8xf32>, vector<8x256xf32>, vector<8x256xf32> -> vector<8x256xf32>
    %c8 = arith.constant 8 : index
    %c0_5 = arith.constant 0 : index
    %8 = vector.load %arg3[%c8, %c0_5] : memref<72x8xf32, #tpu.memory_space<vmem>>, vector<8x8xf32>
    %c16_i32 = arith.constant 16 : i32
    %9 = tpu.dynamic_rotate %0 by %c16_i32 dim 1 : vector<8x256xf32>, i32 -> vector<8x256xf32>
    %10 = vector.extract_strided_slice %1 {offsets = [1, 0], sizes = [1, 256], strides = [1, 1]} : vector<8x256xf32> to vector<1x256xf32>
    %11 = vector.broadcast %10 : vector<1x256xf32> to vector<8x256xf32>
    %12 = arith.mulf %9, %11 : vector<8x256xf32>
    %cst_6 = arith.constant dense<0.000000e+00> : vector<8x256xf32>
    %13 = tpu.matmul %8, %12, %cst_6 {dimension_numbers = #tpu.dot_dimension_numbers<[1], [0], [0], [1], [0, 0, 1, 1], [], []>} : vector<8x8xf32>, vector<8x256xf32>, vector<8x256xf32> -> vector<8x256xf32>
    %14 = arith.addf %7, %13 : vector<8x256xf32>
    %c16 = arith.constant 16 : index
    %c0_7 = arith.constant 0 : index
    %15 = vector.load %arg3[%c16, %c0_7] : memref<72x8xf32, #tpu.memory_space<vmem>>, vector<8x8xf32>
    %c15_i32 = arith.constant 15 : i32
    %16 = tpu.dynamic_rotate %0 by %c15_i32 dim 1 : vector<8x256xf32>, i32 -> vector<8x256xf32>
    %17 = vector.extract_strided_slice %1 {offsets = [2, 0], sizes = [1, 256], strides = [1, 1]} : vector<8x256xf32> to vector<1x256xf32>
    %18 = vector.broadcast %17 : vector<1x256xf32> to vector<8x256xf32>
    %19 = arith.mulf %16, %18 : vector<8x256xf32>
    %cst_8 = arith.constant dense<0.000000e+00> : vector<8x256xf32>
    %20 = tpu.matmul %15, %19, %cst_8 {dimension_numbers = #tpu.dot_dimension_numbers<[1], [0], [0], [1], [0, 0, 1, 1], [], []>} : vector<8x8xf32>, vector<8x256xf32>, vector<8x256xf32> -> vector<8x256xf32>
    %21 = arith.addf %14, %20 : vector<8x256xf32>
    %c24 = arith.constant 24 : index
    %c0_9 = arith.constant 0 : index
    %22 = vector.load %arg3[%c24, %c0_9] : memref<72x8xf32, #tpu.memory_space<vmem>>, vector<8x8xf32>
    %c1_i32 = arith.constant 1 : i32
    %23 = tpu.dynamic_rotate %0 by %c1_i32 dim 1 : vector<8x256xf32>, i32 -> vector<8x256xf32>
    %24 = vector.extract_strided_slice %1 {offsets = [3, 0], sizes = [1, 256], strides = [1, 1]} : vector<8x256xf32> to vector<1x256xf32>
    %25 = vector.broadcast %24 : vector<1x256xf32> to vector<8x256xf32>
    %26 = arith.mulf %23, %25 : vector<8x256xf32>
    %cst_10 = arith.constant dense<0.000000e+00> : vector<8x256xf32>
    %27 = tpu.matmul %22, %26, %cst_10 {dimension_numbers = #tpu.dot_dimension_numbers<[1], [0], [0], [1], [0, 0, 1, 1], [], []>} : vector<8x8xf32>, vector<8x256xf32>, vector<8x256xf32> -> vector<8x256xf32>
    %28 = arith.addf %21, %27 : vector<8x256xf32>
    %c32 = arith.constant 32 : index
    %c0_11 = arith.constant 0 : index
    %29 = vector.load %arg3[%c32, %c0_11] : memref<72x8xf32, #tpu.memory_space<vmem>>, vector<8x8xf32>
    %cst_12 = arith.constant dense<0.000000e+00> : vector<8x256xf32>
    %30 = tpu.matmul %29, %0, %cst_12 {dimension_numbers = #tpu.dot_dimension_numbers<[1], [0], [0], [1], [0, 0, 1, 1], [], []>} : vector<8x8xf32>, vector<8x256xf32>, vector<8x256xf32> -> vector<8x256xf32>
    %31 = arith.addf %28, %30 : vector<8x256xf32>
    %c40 = arith.constant 40 : index
    %c0_13 = arith.constant 0 : index
    %32 = vector.load %arg3[%c40, %c0_13] : memref<72x8xf32, #tpu.memory_space<vmem>>, vector<8x8xf32>
    %c255_i32 = arith.constant 255 : i32
    %33 = tpu.dynamic_rotate %0 by %c255_i32 dim 1 : vector<8x256xf32>, i32 -> vector<8x256xf32>
    %34 = vector.extract_strided_slice %1 {offsets = [4, 0], sizes = [1, 256], strides = [1, 1]} : vector<8x256xf32> to vector<1x256xf32>
    %35 = vector.broadcast %34 : vector<1x256xf32> to vector<8x256xf32>
    %36 = arith.mulf %33, %35 : vector<8x256xf32>
    %cst_14 = arith.constant dense<0.000000e+00> : vector<8x256xf32>
    %37 = tpu.matmul %32, %36, %cst_14 {dimension_numbers = #tpu.dot_dimension_numbers<[1], [0], [0], [1], [0, 0, 1, 1], [], []>} : vector<8x8xf32>, vector<8x256xf32>, vector<8x256xf32> -> vector<8x256xf32>
    %38 = arith.addf %31, %37 : vector<8x256xf32>
    %c48 = arith.constant 48 : index
    %c0_15 = arith.constant 0 : index
    %39 = vector.load %arg3[%c48, %c0_15] : memref<72x8xf32, #tpu.memory_space<vmem>>, vector<8x8xf32>
    %c241_i32 = arith.constant 241 : i32
    %40 = tpu.dynamic_rotate %0 by %c241_i32 dim 1 : vector<8x256xf32>, i32 -> vector<8x256xf32>
    %41 = vector.extract_strided_slice %1 {offsets = [5, 0], sizes = [1, 256], strides = [1, 1]} : vector<8x256xf32> to vector<1x256xf32>
    %42 = vector.broadcast %41 : vector<1x256xf32> to vector<8x256xf32>
    %43 = arith.mulf %40, %42 : vector<8x256xf32>
    %cst_16 = arith.constant dense<0.000000e+00> : vector<8x256xf32>
    %44 = tpu.matmul %39, %43, %cst_16 {dimension_numbers = #tpu.dot_dimension_numbers<[1], [0], [0], [1], [0, 0, 1, 1], [], []>} : vector<8x8xf32>, vector<8x256xf32>, vector<8x256xf32> -> vector<8x256xf32>
    %45 = arith.addf %38, %44 : vector<8x256xf32>
    %c56 = arith.constant 56 : index
    %c0_17 = arith.constant 0 : index
    %46 = vector.load %arg3[%c56, %c0_17] : memref<72x8xf32, #tpu.memory_space<vmem>>, vector<8x8xf32>
    %c240_i32 = arith.constant 240 : i32
    %47 = tpu.dynamic_rotate %0 by %c240_i32 dim 1 : vector<8x256xf32>, i32 -> vector<8x256xf32>
    %48 = vector.extract_strided_slice %1 {offsets = [6, 0], sizes = [1, 256], strides = [1, 1]} : vector<8x256xf32> to vector<1x256xf32>
    %49 = vector.broadcast %48 : vector<1x256xf32> to vector<8x256xf32>
    %50 = arith.mulf %47, %49 : vector<8x256xf32>
    %cst_18 = arith.constant dense<0.000000e+00> : vector<8x256xf32>
    %51 = tpu.matmul %46, %50, %cst_18 {dimension_numbers = #tpu.dot_dimension_numbers<[1], [0], [0], [1], [0, 0, 1, 1], [], []>} : vector<8x8xf32>, vector<8x256xf32>, vector<8x256xf32> -> vector<8x256xf32>
    %52 = arith.addf %45, %51 : vector<8x256xf32>
    %c64 = arith.constant 64 : index
    %c0_19 = arith.constant 0 : index
    %53 = vector.load %arg3[%c64, %c0_19] : memref<72x8xf32, #tpu.memory_space<vmem>>, vector<8x8xf32>
    %c239_i32 = arith.constant 239 : i32
    %54 = tpu.dynamic_rotate %0 by %c239_i32 dim 1 : vector<8x256xf32>, i32 -> vector<8x256xf32>
    %55 = vector.extract_strided_slice %1 {offsets = [7, 0], sizes = [1, 256], strides = [1, 1]} : vector<8x256xf32> to vector<1x256xf32>
    %56 = vector.broadcast %55 : vector<1x256xf32> to vector<8x256xf32>
    %57 = arith.mulf %54, %56 : vector<8x256xf32>
    %cst_20 = arith.constant dense<0.000000e+00> : vector<8x256xf32>
    %58 = tpu.matmul %53, %57, %cst_20 {dimension_numbers = #tpu.dot_dimension_numbers<[1], [0], [0], [1], [0, 0, 1, 1], [], []>} : vector<8x8xf32>, vector<8x256xf32>, vector<8x256xf32> -> vector<8x256xf32>
    %59 = arith.addf %52, %58 : vector<8x256xf32>
    %c0_21 = arith.constant 0 : index
    %c0_22 = arith.constant 0 : index
    %60 = vector.load %arg4[%c0_21, %c0_22] : memref<8x1xf32, #tpu.memory_space<vmem>>, vector<8x1xf32>
    %61 = vector.broadcast %60 : vector<8x1xf32> to vector<8x256xf32>
    %62 = arith.addf %59, %61 : vector<8x256xf32>
    %cst_23 = arith.constant dense<0.000000e+00> : vector<8xf32>
    %63 = vector.multi_reduction <add>, %62, %cst_23 [1] : vector<8x256xf32> to vector<8xf32>
    %64 = vector.shape_cast %63 : vector<8xf32> to vector<8x1xf32>
    %cst_24 = arith.constant 3.906250e-03 : f32
    %65 = vector.broadcast %cst_24 : f32 to vector<8x1xf32>
    %66 = arith.mulf %64, %65 : vector<8x1xf32>
    %67 = arith.mulf %62, %62 : vector<8x256xf32>
    %cst_25 = arith.constant dense<0.000000e+00> : vector<8xf32>
    %68 = vector.multi_reduction <add>, %67, %cst_25 [1] : vector<8x256xf32> to vector<8xf32>
    %69 = vector.shape_cast %68 : vector<8xf32> to vector<8x1xf32>
    %cst_26 = arith.constant 3.906250e-03 : f32
    %70 = vector.broadcast %cst_26 : f32 to vector<8x1xf32>
    %71 = arith.mulf %69, %70 : vector<8x1xf32>
    %72 = arith.mulf %66, %66 : vector<8x1xf32>
    %73 = arith.subf %71, %72 : vector<8x1xf32>
    %74 = vector.broadcast %66 : vector<8x1xf32> to vector<8x256xf32>
    %75 = arith.subf %62, %74 : vector<8x256xf32>
    %cst_27 = arith.constant 9.99999974E-6 : f32
    %76 = vector.broadcast %cst_27 : f32 to vector<8x1xf32>
    %77 = arith.addf %73, %76 : vector<8x1xf32>
    %78 = math.rsqrt %77 : vector<8x1xf32>
    %79 = vector.broadcast %78 : vector<8x1xf32> to vector<8x256xf32>
    %80 = arith.mulf %75, %79 : vector<8x256xf32>
    %cst_28 = arith.constant 0.000000e+00 : f32
    %81 = vector.broadcast %cst_28 : f32 to vector<8x256xf32>
    %82 = arith.maximumf %80, %81 : vector<8x256xf32>
    %c0_29 = arith.constant 0 : index
    %c0_30 = arith.constant 0 : index
    %83 = vector.load %arg5[%c0_29, %c0_30] : memref<72x8xf32, #tpu.memory_space<vmem>>, vector<8x8xf32>
    %c17_i32_31 = arith.constant 17 : i32
    %84 = tpu.dynamic_rotate %82 by %c17_i32_31 dim 1 : vector<8x256xf32>, i32 -> vector<8x256xf32>
    %85 = vector.extract_strided_slice %1 {offsets = [0, 0], sizes = [1, 256], strides = [1, 1]} : vector<8x256xf32> to vector<1x256xf32>
    %86 = vector.broadcast %85 : vector<1x256xf32> to vector<8x256xf32>
    %87 = arith.mulf %84, %86 : vector<8x256xf32>
    %cst_32 = arith.constant dense<0.000000e+00> : vector<8x256xf32>
    %88 = tpu.matmul %83, %87, %cst_32 {dimension_numbers = #tpu.dot_dimension_numbers<[1], [0], [0], [1], [0, 0, 1, 1], [], []>} : vector<8x8xf32>, vector<8x256xf32>, vector<8x256xf32> -> vector<8x256xf32>
    %c8_33 = arith.constant 8 : index
    %c0_34 = arith.constant 0 : index
    %89 = vector.load %arg5[%c8_33, %c0_34] : memref<72x8xf32, #tpu.memory_space<vmem>>, vector<8x8xf32>
    %c16_i32_35 = arith.constant 16 : i32
    %90 = tpu.dynamic_rotate %82 by %c16_i32_35 dim 1 : vector<8x256xf32>, i32 -> vector<8x256xf32>
    %91 = vector.extract_strided_slice %1 {offsets = [1, 0], sizes = [1, 256], strides = [1, 1]} : vector<8x256xf32> to vector<1x256xf32>
    %92 = vector.broadcast %91 : vector<1x256xf32> to vector<8x256xf32>
    %93 = arith.mulf %90, %92 : vector<8x256xf32>
    %cst_36 = arith.constant dense<0.000000e+00> : vector<8x256xf32>
    %94 = tpu.matmul %89, %93, %cst_36 {dimension_numbers = #tpu.dot_dimension_numbers<[1], [0], [0], [1], [0, 0, 1, 1], [], []>} : vector<8x8xf32>, vector<8x256xf32>, vector<8x256xf32> -> vector<8x256xf32>
    %95 = arith.addf %88, %94 : vector<8x256xf32>
    %c16_37 = arith.constant 16 : index
    %c0_38 = arith.constant 0 : index
    %96 = vector.load %arg5[%c16_37, %c0_38] : memref<72x8xf32, #tpu.memory_space<vmem>>, vector<8x8xf32>
    %c15_i32_39 = arith.constant 15 : i32
    %97 = tpu.dynamic_rotate %82 by %c15_i32_39 dim 1 : vector<8x256xf32>, i32 -> vector<8x256xf32>
    %98 = vector.extract_strided_slice %1 {offsets = [2, 0], sizes = [1, 256], strides = [1, 1]} : vector<8x256xf32> to vector<1x256xf32>
    %99 = vector.broadcast %98 : vector<1x256xf32> to vector<8x256xf32>
    %100 = arith.mulf %97, %99 : vector<8x256xf32>
    %cst_40 = arith.constant dense<0.000000e+00> : vector<8x256xf32>
    %101 = tpu.matmul %96, %100, %cst_40 {dimension_numbers = #tpu.dot_dimension_numbers<[1], [0], [0], [1], [0, 0, 1, 1], [], []>} : vector<8x8xf32>, vector<8x256xf32>, vector<8x256xf32> -> vector<8x256xf32>
    %102 = arith.addf %95, %101 : vector<8x256xf32>
    %c24_41 = arith.constant 24 : index
    %c0_42 = arith.constant 0 : index
    %103 = vector.load %arg5[%c24_41, %c0_42] : memref<72x8xf32, #tpu.memory_space<vmem>>, vector<8x8xf32>
    %c1_i32_43 = arith.constant 1 : i32
    %104 = tpu.dynamic_rotate %82 by %c1_i32_43 dim 1 : vector<8x256xf32>, i32 -> vector<8x256xf32>
    %105 = vector.extract_strided_slice %1 {offsets = [3, 0], sizes = [1, 256], strides = [1, 1]} : vector<8x256xf32> to vector<1x256xf32>
    %106 = vector.broadcast %105 : vector<1x256xf32> to vector<8x256xf32>
    %107 = arith.mulf %104, %106 : vector<8x256xf32>
    %cst_44 = arith.constant dense<0.000000e+00> : vector<8x256xf32>
    %108 = tpu.matmul %103, %107, %cst_44 {dimension_numbers = #tpu.dot_dimension_numbers<[1], [0], [0], [1], [0, 0, 1, 1], [], []>} : vector<8x8xf32>, vector<8x256xf32>, vector<8x256xf32> -> vector<8x256xf32>
    %109 = arith.addf %102, %108 : vector<8x256xf32>
    %c32_45 = arith.constant 32 : index
    %c0_46 = arith.constant 0 : index
    %110 = vector.load %arg5[%c32_45, %c0_46] : memref<72x8xf32, #tpu.memory_space<vmem>>, vector<8x8xf32>
    %cst_47 = arith.constant dense<0.000000e+00> : vector<8x256xf32>
    %111 = tpu.matmul %110, %82, %cst_47 {dimension_numbers = #tpu.dot_dimension_numbers<[1], [0], [0], [1], [0, 0, 1, 1], [], []>} : vector<8x8xf32>, vector<8x256xf32>, vector<8x256xf32> -> vector<8x256xf32>
    %112 = arith.addf %109, %111 : vector<8x256xf32>
    %c40_48 = arith.constant 40 : index
    %c0_49 = arith.constant 0 : index
    %113 = vector.load %arg5[%c40_48, %c0_49] : memref<72x8xf32, #tpu.memory_space<vmem>>, vector<8x8xf32>
    %c255_i32_50 = arith.constant 255 : i32
    %114 = tpu.dynamic_rotate %82 by %c255_i32_50 dim 1 : vector<8x256xf32>, i32 -> vector<8x256xf32>
    %115 = vector.extract_strided_slice %1 {offsets = [4, 0], sizes = [1, 256], strides = [1, 1]} : vector<8x256xf32> to vector<1x256xf32>
    %116 = vector.broadcast %115 : vector<1x256xf32> to vector<8x256xf32>
    %117 = arith.mulf %114, %116 : vector<8x256xf32>
    %cst_51 = arith.constant dense<0.000000e+00> : vector<8x256xf32>
    %118 = tpu.matmul %113, %117, %cst_51 {dimension_numbers = #tpu.dot_dimension_numbers<[1], [0], [0], [1], [0, 0, 1, 1], [], []>} : vector<8x8xf32>, vector<8x256xf32>, vector<8x256xf32> -> vector<8x256xf32>
    %119 = arith.addf %112, %118 : vector<8x256xf32>
    %c48_52 = arith.constant 48 : index
    %c0_53 = arith.constant 0 : index
    %120 = vector.load %arg5[%c48_52, %c0_53] : memref<72x8xf32, #tpu.memory_space<vmem>>, vector<8x8xf32>
    %c241_i32_54 = arith.constant 241 : i32
    %121 = tpu.dynamic_rotate %82 by %c241_i32_54 dim 1 : vector<8x256xf32>, i32 -> vector<8x256xf32>
    %122 = vector.extract_strided_slice %1 {offsets = [5, 0], sizes = [1, 256], strides = [1, 1]} : vector<8x256xf32> to vector<1x256xf32>
    %123 = vector.broadcast %122 : vector<1x256xf32> to vector<8x256xf32>
    %124 = arith.mulf %121, %123 : vector<8x256xf32>
    %cst_55 = arith.constant dense<0.000000e+00> : vector<8x256xf32>
    %125 = tpu.matmul %120, %124, %cst_55 {dimension_numbers = #tpu.dot_dimension_numbers<[1], [0], [0], [1], [0, 0, 1, 1], [], []>} : vector<8x8xf32>, vector<8x256xf32>, vector<8x256xf32> -> vector<8x256xf32>
    %126 = arith.addf %119, %125 : vector<8x256xf32>
    %c56_56 = arith.constant 56 : index
    %c0_57 = arith.constant 0 : index
    %127 = vector.load %arg5[%c56_56, %c0_57] : memref<72x8xf32, #tpu.memory_space<vmem>>, vector<8x8xf32>
    %c240_i32_58 = arith.constant 240 : i32
    %128 = tpu.dynamic_rotate %82 by %c240_i32_58 dim 1 : vector<8x256xf32>, i32 -> vector<8x256xf32>
    %129 = vector.extract_strided_slice %1 {offsets = [6, 0], sizes = [1, 256], strides = [1, 1]} : vector<8x256xf32> to vector<1x256xf32>
    %130 = vector.broadcast %129 : vector<1x256xf32> to vector<8x256xf32>
    %131 = arith.mulf %128, %130 : vector<8x256xf32>
    %cst_59 = arith.constant dense<0.000000e+00> : vector<8x256xf32>
    %132 = tpu.matmul %127, %131, %cst_59 {dimension_numbers = #tpu.dot_dimension_numbers<[1], [0], [0], [1], [0, 0, 1, 1], [], []>} : vector<8x8xf32>, vector<8x256xf32>, vector<8x256xf32> -> vector<8x256xf32>
    %133 = arith.addf %126, %132 : vector<8x256xf32>
    %c64_60 = arith.constant 64 : index
    %c0_61 = arith.constant 0 : index
    %134 = vector.load %arg5[%c64_60, %c0_61] : memref<72x8xf32, #tpu.memory_space<vmem>>, vector<8x8xf32>
    %c239_i32_62 = arith.constant 239 : i32
    %135 = tpu.dynamic_rotate %82 by %c239_i32_62 dim 1 : vector<8x256xf32>, i32 -> vector<8x256xf32>
    %136 = vector.extract_strided_slice %1 {offsets = [7, 0], sizes = [1, 256], strides = [1, 1]} : vector<8x256xf32> to vector<1x256xf32>
    %137 = vector.broadcast %136 : vector<1x256xf32> to vector<8x256xf32>
    %138 = arith.mulf %135, %137 : vector<8x256xf32>
    %cst_63 = arith.constant dense<0.000000e+00> : vector<8x256xf32>
    %139 = tpu.matmul %134, %138, %cst_63 {dimension_numbers = #tpu.dot_dimension_numbers<[1], [0], [0], [1], [0, 0, 1, 1], [], []>} : vector<8x8xf32>, vector<8x256xf32>, vector<8x256xf32> -> vector<8x256xf32>
    %140 = arith.addf %133, %139 : vector<8x256xf32>
    %c0_64 = arith.constant 0 : index
    %c0_65 = arith.constant 0 : index
    %141 = vector.load %arg6[%c0_64, %c0_65] : memref<8x1xf32, #tpu.memory_space<vmem>>, vector<8x1xf32>
    %142 = vector.broadcast %141 : vector<8x1xf32> to vector<8x256xf32>
    %143 = arith.addf %140, %142 : vector<8x256xf32>
    %cst_66 = arith.constant dense<0.000000e+00> : vector<8xf32>
    %144 = vector.multi_reduction <add>, %143, %cst_66 [1] : vector<8x256xf32> to vector<8xf32>
    %145 = vector.shape_cast %144 : vector<8xf32> to vector<8x1xf32>
    %cst_67 = arith.constant 3.906250e-03 : f32
    %146 = vector.broadcast %cst_67 : f32 to vector<8x1xf32>
    %147 = arith.mulf %145, %146 : vector<8x1xf32>
    %148 = arith.mulf %143, %143 : vector<8x256xf32>
    %cst_68 = arith.constant dense<0.000000e+00> : vector<8xf32>
    %149 = vector.multi_reduction <add>, %148, %cst_68 [1] : vector<8x256xf32> to vector<8xf32>
    %150 = vector.shape_cast %149 : vector<8xf32> to vector<8x1xf32>
    %cst_69 = arith.constant 3.906250e-03 : f32
    %151 = vector.broadcast %cst_69 : f32 to vector<8x1xf32>
    %152 = arith.mulf %150, %151 : vector<8x1xf32>
    %153 = arith.mulf %147, %147 : vector<8x1xf32>
    %154 = arith.subf %152, %153 : vector<8x1xf32>
    %155 = vector.broadcast %147 : vector<8x1xf32> to vector<8x256xf32>
    %156 = arith.subf %143, %155 : vector<8x256xf32>
    %cst_70 = arith.constant 9.99999974E-6 : f32
    %157 = vector.broadcast %cst_70 : f32 to vector<8x1xf32>
    %158 = arith.addf %154, %157 : vector<8x1xf32>
    %159 = math.rsqrt %158 : vector<8x1xf32>
    %160 = vector.broadcast %159 : vector<8x1xf32> to vector<8x256xf32>
    %161 = arith.mulf %156, %160 : vector<8x256xf32>
    %162 = arith.addf %161, %0 : vector<8x256xf32>
    %c0_71 = arith.constant 0 : index
    %c0_72 = arith.constant 0 : index
    %163 = vector.load %arg7[%c0_71, %c0_72] : memref<8x256xf32, #tpu.memory_space<vmem>>, vector<8x256xf32>
    tpu.vector_store %arg7[%c0_71, %c0_72], %162 {strides = array<i32>} : memref<8x256xf32, #tpu.memory_space<vmem>>, vector<8x256xf32>,
    return
  }
  func.func @transform_0(%arg0: i32) -> (i32, i32) {
    %c0_i32 = arith.constant 0 : i32
    %c0_i32_0 = arith.constant 0 : i32
    return %c0_i32, %arg0 : i32, i32
  }
  func.func @transform_1(%arg0: i32) -> (i32, i32) {
    %c0_i32 = arith.constant 0 : i32
    %c0_i32_0 = arith.constant 0 : i32
    %c0_i32_1 = arith.constant 0 : i32
    return %c0_i32, %c0_i32_0 : i32, i32
  }
  func.func @transform_2(%arg0: i32) -> (i32, i32) {
    %c0_i32 = arith.constant 0 : i32
    %c0_i32_0 = arith.constant 0 : i32
    %c0_i32_1 = arith.constant 0 : i32
    return %c0_i32, %c0_i32_0 : i32, i32
  }
  func.func @transform_3(%arg0: i32) -> (i32, i32) {
    %c0_i32 = arith.constant 0 : i32
    %c0_i32_0 = arith.constant 0 : i32
    %c0_i32_1 = arith.constant 0 : i32
    return %c0_i32, %c0_i32_0 : i32, i32
  }
  func.func @transform_4(%arg0: i32) -> (i32, i32) {
    %c0_i32 = arith.constant 0 : i32
    %c0_i32_0 = arith.constant 0 : i32
    %c0_i32_1 = arith.constant 0 : i32
    return %c0_i32, %c0_i32_0 : i32, i32
  }
  func.func @transform_5(%arg0: i32) -> (i32, i32) {
    %c0_i32 = arith.constant 0 : i32
    %c0_i32_0 = arith.constant 0 : i32
    %c0_i32_1 = arith.constant 0 : i32
    return %c0_i32, %c0_i32_0 : i32, i32
  }
  func.func @transform_6(%arg0: i32) -> (i32, i32) {
    %c0_i32 = arith.constant 0 : i32
    %c0_i32_0 = arith.constant 0 : i32
    return %c0_i32, %arg0 : i32, i32
  }
}

</mosaic_0001>

<bundles_post_ra>
// kernel: tpu_custom_call.1
= control target key start
LH: loop header
LB: loop body
LE: loop exit
PB: predicated region body
PF: predicated region fallthrough
CT: control target
= control target key end

     0   :  { %11 = vsyncpa [#allocation3], 0  ;;  %s1996_s0 = inlined_call_operand.vmem [shape: f32[8,512], index: 0, kind: input, shape index: {}]   ;;  %s1997_s1 = inlined_call_operand.vmem [shape: f32[8,256], index: 1, kind: input, shape index: {}]   ;;  %s1998_s2 = inlined_call_operand.vmem [shape: f32[72,8], index: 2, kind: input, shape index: {}]   ;;  %s1999_s3 = inlined_call_operand.vmem [shape: f32[8,1], index: 3, kind: input, shape index: {}]   ;;  %s2000_s4 = inlined_call_operand.vmem [shape: f32[72,8], index: 4, kind: input, shape index: {}]   ;;  %s2001_s5 = inlined_call_operand.vmem [shape: f32[8,1], index: 5, kind: input, shape index: {}]   ;;  %s2002_s6 = inlined_call_operand.hbm [shape: f32[8,512], index: 6, kind: output, shape index: {}]  }
   0x1   :  { %13 = vsyncpa [#allocation3 + $0x1], 0  ;;  %s1596_s21 = smov 0   ;;  %s1598_s22 = smov 0  }
   0x2   :  { %s1600_s23 = smov 0   ;;  %s1602_s24 = smov 0  }
   0x3 LB: > { %s1617_s25 = sadd.s32 4294967295, %s1550_s24   ;;  %s1384_s26 = sadd.s32 4294967294, %s1550_s24   ;;  %s1550_s24 = sphi %s1602_s24, %s2008_s24   ;;  %s1546_s23 = sphi %s1600_s23, %s2007_s23   ;;  %s1542_s22 = sphi %s1598_s22, %s2006_s22   ;;  %s1538_s21 = sphi %s1596_s21, %s2005_s21  }
   0x4   : > { %s1621_s27 = sadd.s32 1, %s1550_s24   ;;  %s157_s28 = sadd.s32 1, %s1546_s23 }
   0x5   : > { %s154_s29 = ssub.s32 %s1550_s24, %s1621_s27  ;;  %p167_p0 = scmp.ne.s32.totalorder %s1546_s23, %s1542_s22 }
   0x6   : > { %p155_p1 = scmp.eq.s32.totalorder %s154_s29, 0  ;;  %p168_p2 = scmp.eq.s32.totalorder %s1617_s25, 1 }
   0x7   : > { %p173_p3 = scmp.ne.s32.totalorder %s1542_s22, %s1538_s21  ;;  %p174_p4 = scmp.eq.s32.totalorder %s1384_s26, 1 }
   0x8   : > { %s1632_s30 = scalar_select %p155_p1, %s1546_s23, %s157_s28  }
   0x9   : > { %p1634_p5 = por %p168_p2, %p167_p0  ;;  %p1638_p6 = por %p174_p4, %p173_p3 }
   0xa   : > { %p1387_p7 = scmp.ge.s32.totalorder %s1550_s24, 1  ;;  %p216_p8 = scmp.lt.s32.totalorder %s1550_s24, 3 }
   0xc   : > { %p217_p9 = pnand %p1387_p7, %p216_p8 }
   0xd   : > { %s1389_s9 = sshll.u32 (!%p217_p9), %s1617_s25, 1  ;;  %s1552_s14 = smov (!%p217_p9), 16  }
   0xe   : > { %220 = sbr.rel (%p217_p9) target bundleno = 938 (0x3aa), region = 44  ;;  %p247_p10 = scmp.lt.s32.totalorder (!%p217_p9), %s1389_s9, 3 }
   0xf   : > { %s1553_s15 = smov (!%p217_p9), 17   ;;  %s1554_s16 = smov (!%p217_p9), 15  }
  0x10   : > { %s1555_s17 = smov (!%p217_p9), 1   ;;  %s1556_s18 = smov (!%p217_p9), 127  }
  0x11   : > { %s1557_s19 = smov (!%p217_p9), 113   ;;  %s1558_s20 = smov (!%p217_p9), 112  }
  0x12   : > { %s1559_s26 = smov (!%p217_p9), 111  }
  0x13   : > { %s2010_s9 = smov (!%p247_p10, %s1389_s9), 3  ;;  %v262_v3 = vlaneseq  ;;  %v1689_v8 = vld [vmem:[%s1997_s1] sm:$0xff]  ;;  %v1694_v9 = vld [vmem:[%s1997_s1 + $0x8] sm:$0xff]  ;;  %vm283_vm3 = vcmask 64512   ;;  %v1560_v42 = vmov 0   ;;  %v370_v43 = vld [vmem:[%s1998_s2 + $0x10] sm:$0xff] }
  0x14   : > { %s1390_s10 = sshll.u32 %s2010_s9, 3  ;;  %v279_v10 = vperm.slane %v1689_v8, 1  ;;  %v280_v11 = vperm.slane %v1694_v9, 1  ;;  %v267_v12 = vperm.slane %v1689_v8, 0  ;;  %v268_v13 = vperm.slane %v1694_v9, 0  ;;  %v271_v28 = vld [vmem:[%s1998_s2 + $0x8] sm:$0xff]  ;;  %1481 = vset.pattern.permute.xlu1 %v1560_v42  ;;  %1482 = vset.pattern.permute.xlu2 %v1560_v42 }
  0x15   : > { %s250_s13 = scalar_lea.vmem %s1996_s0, %s1390_s10  ;;  %v1684_v6 = vand.u32 127, %v262_v3  ;;  %v378_v18 = vperm.slane %v1689_v8, 2  ;;  %v379_v19 = vperm.slane %v1694_v9, 2  ;;  %v257_v29 = vld [vmem:[%s1998_s2] sm:$0xff]  ;;  %v435_v33 = vperm.slane %v1689_v8, 3  ;;  %1483 = vset.pattern.permute.xlu0 %v1560_v42  ;;  %v427_v44 = vld [vmem:[%s1998_s2 + $0x18] sm:$0xff] }
  0x16   : > { %v1648_v0 = vld [vmem:[%s250_s13] sm:$0xff]  ;;  %v1656_v1 = vld [vmem:[%s250_s13 + $0x8] sm:$0xff]  ;;  %v436_v34 = vperm.slane %v1694_v9, 3  ;;  %v595_v45 = vperm.slane %v1689_v8, 5  ;;  %v596_v47 = vperm.slane %v1694_v9, 5  ;;  %v538_v48 = vperm.slane %v1689_v8, 4 }
  0x17   : > { %272 = vrot.lane.b32.xlu1 %v1648_v0, %s1552_s14  ;;  %258 = vrot.lane.b32.xlu0 %v1648_v0, %s1553_s15  ;;  %vm375_vm0 = vcmp.lt.s32.totalorder %v1684_v6, 15  ;;  %vm276_vm1 = vcmp.lt.s32.totalorder %v1684_v6, 16  ;;  %vm264_vm2 = vcmp.lt.s32.totalorder %v1684_v6, 17  ;;  %vm432_vm4 = vcmp.lt.s32.totalorder %v1684_v6, 1  ;;  %v758_v37 = vld [vmem:[%s1999_s3] sm:$0xff]  ;;  %v530_v61 = vld [vmem:[%s1998_s2 + $0x28] sm:$0xff] }
  0x18   : > { %371 = vrot.lane.b32.xlu2 %v1648_v0, %s1554_s16  ;;  %vm592_vm5 = vcmp.lt.s32.totalorder %v1684_v6, 113  ;;  %vm535_vm6 = vcmp.lt.s32.totalorder %v1684_v6, 127  ;;  %v539_v49 = vperm.slane %v1694_v9, 4  ;;  %v484_v60 = vld [vmem:[%s1998_s2 + $0x20] sm:$0xff]  ;;  %vm649_vm7 = vcmp.lt.s32.totalorder %v1684_v6, 112 }
  0x19   : > { %v652_v62 = vperm.slane %v1689_v8, 6  ;;  %v653_v63 = vperm.slane %v1694_v9, 6  ;;  %vm706_vm8 = vcmp.lt.s32.totalorder %v1684_v6, 111 }
  0x1f   : > { %274 = vrot.lane.b32.xlu1 %v1656_v1, %s1552_s14  ;;  %260 = vrot.lane.b32.xlu0 %v1656_v1, %s1553_s15 }
  0x20   : > { %373 = vrot.lane.b32.xlu2 %v1656_v1, %s1554_s16 }
  0x27   : > { %430 = vrot.lane.b32.xlu1 %v1656_v1, %s1555_s17  ;;  %428 = vrot.lane.b32.xlu0 %v1648_v0, %s1555_s17 }
  0x28   : > { %531 = vrot.lane.b32.xlu2 %v1648_v0, %s1556_s18 }
  0x2f   : > { %588 = vrot.lane.b32.xlu1 %v1648_v0, %s1557_s19  ;;  %533 = vrot.lane.b32.xlu0 %v1656_v1, %s1556_s18 }
  0x30   : > { %590 = vrot.lane.b32.xlu2 %v1656_v1, %s1557_s19 }
  0x37   : > { %647 = vrot.lane.b32.xlu1 %v1656_v1, %s1558_s20  ;;  %645 = vrot.lane.b32.xlu0 %v1648_v0, %s1558_s20 }
  0x38   : > { %702 = vrot.lane.b32.xlu2 %v1648_v0, %s1559_s26 }
  0x3f   : > { %704 = vrot.lane.b32.xlu0 %v1656_v1, %s1559_s26  ;;  %761 = vperm.xlu1 %1481, %v758_v37  }
  0x72   : > { %v372_v2 = vpop.permute.xlu2 %371 }
  0x7a   : > { %v374_v7 = vpop.permute.xlu2 %373 }
  0x7b   : > { %v376_v14 = vsel %vm375_vm0, %v372_v2, %v374_v7  ;;  %v377_v15 = vsel %vm375_vm0, %v374_v7, %v372_v2 }
  0x7c   : > { %v380_v30 = vmul.f32 %v378_v18, %v377_v15  ;;  %v381_v31 = vmul.f32 %v379_v19, %v376_v14  ;;  %v587_v15 = vld [vmem:[%s1998_s2 + $0x30] sm:$0xff] }
  0x82   : > { %v532_v32 = vpop.permute.xlu2 %531 }
  0x89   : > { %v273_v4 = vpop.permute.xlu1 %272  ;;  %v259_v5 = vpop.permute.xlu0 %258 }
  0x8a   : > { %v591_v46 = vpop.permute.xlu2 %590 }
  0x91   : > { %v275_v16 = vpop.permute.xlu1 %274  ;;  %v261_v17 = vpop.permute.xlu0 %260 }
  0x92   : > { %v278_v20 = vsel %vm276_vm1, %v275_v16, %v273_v4  ;;  %v277_v21 = vsel %vm276_vm1, %v273_v4, %v275_v16  ;;  %v266_v22 = vsel %vm264_vm2, %v261_v17, %v259_v5  ;;  %v265_v23 = vsel %vm264_vm2, %v259_v5, %v261_v17  ;;  %v644_v16 = vld [vmem:[%s1998_s2 + $0x38] sm:$0xff]  ;;  %v703_v17 = vpop.permute.xlu2 %702 }
  0x93   : > { %v281_v24 = vmul.f32 %v279_v10, %v278_v20  ;;  %v282_v25 = vmul.f32 %v280_v11, %v277_v21  ;;  %v269_v26 = vmul.f32 %v267_v12, %v266_v22  ;;  %v270_v27 = vmul.f32 %v268_v13, %v265_v23 }
  0x94   : > { %v709_v20 = vperm.slane %v1689_v8, 7  ;;  %v710_v21 = vperm.slane %v1694_v9, 7 }
  0x95   : > { %302 = vmatpush.msra.mxu0 %v281_v24  ;;  %322 = vmatpush.msra.mxu1 %v282_v25 }
  0x96   : > { %345 = vmatpush.msra.mxu2 %v269_v26  ;;  %365 = vmatpush.msra.mxu3 %v270_v27  ;;  %v701_v27 = vld [vmem:[%s1998_s2 + $0x40] sm:$0xff] }
  0x97   : > { %1391 = vmatmul.msk.f32.vlgmr.msra.gmra.mxu0 %vm283_vm3, %v271_v28  ;;  %1392 = vmatmul.msk.f32.vlgmr.msra.gmra.mxu1 %vm283_vm3, %v271_v28 }
  0x98   : > { %1393 = vmatmul.msk.f32.vlgmr.msra.gmra.mxu2 %vm283_vm3, %v257_v29  ;;  %1394 = vmatmul.msk.f32.vlgmr.msra.gmra.mxu3 %vm283_vm3, %v257_v29 }
  0x99   : > { %400 = vmatpush.msrb.mxu0 %v380_v30  ;;  %420 = vmatpush.msrb.mxu1 %v381_v31  ;;  %v431_v35 = vpop.permute.xlu1 %430  ;;  %v429_v36 = vpop.permute.xlu0 %428 }
  0x9a   : > { %v433_v38 = vsel %vm432_vm4, %v429_v36, %v431_v35  ;;  %v434_v39 = vsel %vm432_vm4, %v431_v35, %v429_v36 }
  0x9b   : > { %503 = vmatpush.msra.mxu0 %v1648_v0  ;;  %523 = vmatpush.msra.mxu1 %v1656_v1  ;;  %v437_v40 = vmul.f32 %v435_v33, %v434_v39  ;;  %v438_v41 = vmul.f32 %v436_v34, %v433_v38 }
  0x9d   : > { %457 = vmatpush.msrb.mxu2 %v437_v40  ;;  %477 = vmatpush.msrb.mxu3 %v438_v41 }
  0x9f   : > { %1395 = vmatmul.msk.f32.vlgmr.msrb.gmra.mxu0 %vm283_vm3, %v370_v43  ;;  %1396 = vmatmul.msk.f32.vlgmr.msrb.gmra.mxu1 %vm283_vm3, %v370_v43 }
  0xa0   : > { %1397 = vmatmul.msk.f32.vlgmr.msrb.gmra.mxu2 %vm283_vm3, %v427_v44  ;;  %1398 = vmatmul.msk.f32.vlgmr.msrb.gmra.mxu3 %vm283_vm3, %v427_v44 }
  0xa1   : > { %v589_v50 = vpop.permute.xlu1 %588  ;;  %v534_v51 = vpop.permute.xlu0 %533 }
  0xa2   : > { %v593_v52 = vsel %vm592_vm5, %v589_v50, %v591_v46  ;;  %v594_v53 = vsel %vm592_vm5, %v591_v46, %v589_v50  ;;  %v536_v54 = vsel %vm535_vm6, %v532_v32, %v534_v51  ;;  %v537_v55 = vsel %vm535_vm6, %v534_v51, %v532_v32 }
  0xa3   : > { %v597_v56 = vmul.f32 %v595_v45, %v593_v52  ;;  %v598_v57 = vmul.f32 %v596_v47, %v594_v53  ;;  %v540_v58 = vmul.f32 %v538_v48, %v536_v54  ;;  %v541_v59 = vmul.f32 %v539_v49, %v537_v55 }
  0xa5   : > { %560 = vmatpush.msra.mxu2 %v540_v58  ;;  %580 = vmatpush.msra.mxu3 %v541_v59 }
  0xa6   : > { %617 = vmatpush.msrb.mxu0 %v597_v56  ;;  %637 = vmatpush.msrb.mxu1 %v598_v57 }
  0xa7   : > { %1399 = vmatmul.msk.f32.vlgmr.msra.gmra.mxu0 %vm283_vm3, %v484_v60  ;;  %1400 = vmatmul.msk.f32.vlgmr.msra.gmra.mxu1 %vm283_vm3, %v484_v60 }
  0xa8   : > { %1401 = vmatmul.msk.f32.vlgmr.msra.gmra.mxu2 %vm283_vm3, %v530_v61  ;;  %1402 = vmatmul.msk.f32.vlgmr.msra.gmra.mxu3 %vm283_vm3, %v530_v61 }
  0xa9   : > { %v648_v2 = vpop.permute.xlu1 %647  ;;  %v646_v3 = vpop.permute.xlu0 %645 }
  0xaa   : > { %v650_v4 = vsel %vm649_vm7, %v646_v3, %v648_v2  ;;  %v651_v5 = vsel %vm649_vm7, %v648_v2, %v646_v3 }
  0xab   : > { %v654_v7 = vmul.f32 %v652_v62, %v650_v4  ;;  %v655_v14 = vmul.f32 %v653_v63, %v651_v5 }
  0xad   : > { %674 = vmatpush.msrb.mxu2 %v654_v7  ;;  %694 = vmatpush.msrb.mxu3 %v655_v14 }
  0xaf   : > { %1403 = vmatmul.msk.f32.vlgmr.msrb.gmra.mxu0 %vm283_vm3, %v587_v15  ;;  %1404 = vmatmul.msk.f32.vlgmr.msrb.gmra.mxu1 %vm283_vm3, %v587_v15 }
  0xb0   : > { %1405 = vmatmul.msk.f32.vlgmr.msrb.gmra.mxu2 %vm283_vm3, %v644_v16  ;;  %1406 = vmatmul.msk.f32.vlgmr.msrb.gmra.mxu3 %vm283_vm3, %v644_v16 }
  0xb1   : > { %v705_v22 = vpop.permute.xlu0 %704  ;;  %v762_v7 = vpop.permute.xlu1 %761 }
  0xb2   : > { %v707_v23 = vsel %vm706_vm8, %v703_v17, %v705_v22  ;;  %v708_v24 = vsel %vm706_vm8, %v705_v22, %v703_v17 }
  0xb3   : > { %v711_v25 = vmul.f32 %v709_v20, %v707_v23  ;;  %v712_v26 = vmul.f32 %v710_v21, %v708_v24 }
  0xb5   : > { %731 = vmatpush.msra.mxu0 %v711_v25  ;;  %751 = vmatpush.msra.mxu1 %v712_v26 }
  0xb7   : > { %1407 = vmatmul.msk.f32.vlgmr.msra.gmra.mxu0 %vm283_vm3, %v701_v27  ;;  %1408 = vmatmul.msk.f32.vlgmr.msra.gmra.mxu1 %vm283_vm3, %v701_v27 }
 0x114   : > { %v304_v28 = vpop.f32.mrf.mxu0  ;;  %v324_v29 = vpop.f32.mrf.mxu1 }
 0x11b   : > { %v347_v30 = vpop.f32.mrf.mxu2  ;;  %v367_v31 = vpop.f32.mrf.mxu3 }
 0x11c   : > { %v402_v32 = vpop.f32.mrf.mxu0  ;;  %v422_v35 = vpop.f32.mrf.mxu1  ;;  %v348_v36 = vadd.f32 %v347_v30, %v304_v28  ;;  %v368_v37 = vadd.f32 %v367_v31, %v324_v29 }
 0x11e   : > { %v425_v42 = vadd.f32 %v402_v32, %v348_v36  ;;  %v426_v43 = vadd.f32 %v422_v35, %v368_v37 }
 0x123   : > { %v459_v38 = vpop.f32.mrf.mxu2  ;;  %v479_v39 = vpop.f32.mrf.mxu3 }
 0x124   : > { %v505_v40 = vpop.f32.mrf.mxu0  ;;  %v525_v41 = vpop.f32.mrf.mxu1  ;;  %v482_v44 = vadd.f32 %v459_v38, %v425_v42  ;;  %v483_v46 = vadd.f32 %v479_v39, %v426_v43 }
 0x126   : > { %v528_v52 = vadd.f32 %v505_v40, %v482_v44  ;;  %v529_v53 = vadd.f32 %v525_v41, %v483_v46 }
 0x12b   : > { %v562_v50 = vpop.f32.mrf.mxu2  ;;  %v582_v51 = vpop.f32.mrf.mxu3 }
 0x12c   : > { %v619_v54 = vpop.f32.mrf.mxu0  ;;  %v639_v55 = vpop.f32.mrf.mxu1  ;;  %v585_v56 = vadd.f32 %v562_v50, %v528_v52  ;;  %v586_v57 = vadd.f32 %v582_v51, %v529_v53 }
 0x12e   : > { %v642_v58 = vadd.f32 %v619_v54, %v585_v56  ;;  %v643_v59 = vadd.f32 %v639_v55, %v586_v57 }
 0x133   : > { %v676_v60 = vpop.f32.mrf.mxu2  ;;  %v696_v61 = vpop.f32.mrf.mxu3 }
 0x134   : > { %v699_v2 = vadd.f32 %v676_v60, %v642_v58  ;;  %v700_v3 = vadd.f32 %v696_v61, %v643_v59  ;;  %v733_v4 = vpop.f32.mrf.mxu0  ;;  %v753_v5 = vpop.f32.mrf.mxu1  ;;  %v804_v58 = vld [vmem:[%s2000_s4 + $0x8] sm:$0xff] }
 0x136   : > { %v756_v14 = vadd.f32 %v733_v4, %v699_v2  ;;  %v757_v15 = vadd.f32 %v753_v5, %v700_v3  ;;  %v899_v4 = vld [vmem:[%s2000_s4 + $0x10] sm:$0xff] }
 0x138   : > { %v764_v16 = vadd.f32 %v762_v7, %v756_v14  ;;  %v765_v17 = vadd.f32 %v762_v7, %v757_v15 }
 0x13a   : > { %v766_v22 = vadd.f32 %v765_v17, %v764_v16  ;;  %v770_v23 = vmul.f32 %v764_v16, %v764_v16  ;;  %v771_v24 = vmul.f32 %v765_v17, %v765_v17 }
 0x13c   : > { %767 = vadd.xlane.f32.xlu2 %v766_v22  ;;  %v772_v25 = vadd.f32 %v771_v24, %v770_v23 }
 0x13e   : > { %773 = vadd.xlane.f32.xlu0 %v772_v25 }
 0x1af   : > { %v768_v26 = vpop.xlane.xlu2 %767 }
 0x1b0   : > { %v769_v27 = vmul.f32 0.00390625, %v768_v26 }
 0x1b1   : > { %v774_v28 = vpop.xlane.xlu0 %773 }
 0x1b2   : > { %v775_v29 = vmul.f32 0.00390625, %v774_v28  ;;  %v776_v30 = vmul.f32 %v769_v27, %v769_v27  ;;  %v778_v41 = vsub.f32 %v764_v16, %v769_v27  ;;  %v779_v42 = vsub.f32 %v765_v17, %v769_v27  ;;  %v795_v16 = vld [vmem:[%s2000_s4] sm:$0xff] }
 0x1b3   : > { %v1007_v17 = vld [vmem:[%s2000_s4 + $0x20] sm:$0xff] }
 0x1b4   : > { %v777_v31 = vsub.f32 %v775_v29, %v776_v30 }
 0x1b6   : > { %v780_v32 = vadd.f32 1e-05, %v777_v31  ;;  %v953_v31 = vld [vmem:[%s2000_s4 + $0x18] sm:$0xff] }
 0x1b8   : > { %1484 = vrsqrt.f32 %v780_v32  ;;  %vm787_vm10 = vweird.f32 %v780_v32 }
 0x1be   : > { %v1485_v35 = vpop.eup %1484 }
 0x1bf   : > { %v782_v36 = vmul.f32 %v1485_v35, %v780_v32  ;;  %vm788_vm9 = vweird.f32 %v1485_v35 }
 0x1c0   : > { %vm789_vm11 = vmor %vm787_vm10, %vm788_vm9 }
 0x1c1   : > { %v783_v37 = vmul.f32 %v1485_v35, %v782_v36 }
 0x1c3   : > { %v784_v38 = vmul.f32 0.5, %v783_v37 }
 0x1c5   : > { %v785_v39 = vsub.f32 1.5, %v784_v38  ;;  %v1107_v38 = vld [vmem:[%s2000_s4 + $0x30] sm:$0xff] }
 0x1c7   : > { %v786_v40 = vmul.f32 %v1485_v35, %v785_v39 }
 0x1c9   : > { %v790_v43 = vsel %vm789_vm11, %v1485_v35, %v786_v40 }
 0x1ca   : > { %v791_v44 = vmul.f32 %v790_v43, %v778_v41  ;;  %v792_v46 = vmul.f32 %v790_v43, %v779_v42  ;;  %v1215_v43 = vld [vmem:[%s2000_s4 + $0x40] sm:$0xff] }
 0x1cc   : > { %v793_v50 = vmax.f32 %v791_v44, 0.0  ;;  %v794_v51 = vmax.f32 %v792_v46, 0.0 }
 0x1ce   : > { %956 = vrot.lane.b32.xlu0 %v794_v51, %s1555_s17  ;;  %798 = vrot.lane.b32.xlu2 %v794_v51, %s1553_s15 }
 0x1cf   : > { %805 = vrot.lane.b32.xlu1 %v793_v50, %s1552_s14 }
 0x1d6   : > { %1056 = vrot.lane.b32.xlu0 %v794_v51, %s1556_s18  ;;  %1054 = vrot.lane.b32.xlu2 %v793_v50, %s1556_s18 }
 0x1d7   : > { %807 = vrot.lane.b32.xlu1 %v794_v51, %s1552_s14 }
 0x1de   : > { %1162 = vrot.lane.b32.xlu0 %v793_v50, %s1558_s20  ;;  %1218 = vrot.lane.b32.xlu2 %v794_v51, %s1559_s26 }
 0x1df   : > { %900 = vrot.lane.b32.xlu1 %v793_v50, %s1554_s16 }
 0x1e7   : > { %902 = vrot.lane.b32.xlu1 %v794_v51, %s1554_s16 }
 0x1ef   : > { %796 = vrot.lane.b32.xlu1 %v793_v50, %s1553_s15 }
 0x1f7   : > { %954 = vrot.lane.b32.xlu1 %v793_v50, %s1555_s17  ;;  %s1508_s17 = scalar_lea.hbm %s2002_s6, 32 }
 0x1ff   : > { %1108 = vrot.lane.b32.xlu1 %v793_v50, %s1557_s19 }
 0x207   : > { %1110 = vrot.lane.b32.xlu1 %v794_v51, %s1557_s19  ;;  %s243_s19 = sand.u32 1, %s1542_s22  }
 0x20f   : > { %1216 = vrot.lane.b32.xlu1 %v793_v50, %s1559_s26  ;;  %s1432_s26 = sshll.u32 %s1617_s25, 4  ;;  %s1309_s25 = scalar_lea.sflag [#allocation3], %s243_s19 }
 0x210   : > { %s1320_s12 = scalar_lea.hbm %s2002_s6, %s1432_s26 }
 0x211   : > { %s1324_s29 = sshll.u32 %s1320_s12, 4  ;;  %s1325_s29 = int_to_ptr.hbm [resolvable:$true] %s1324_s29 }
 0x212   : > { %s1502_s9 = sshra.s32 %s1325_s29, 4  ;;  %s1503_s9 = int_to_ptr.hbm [resolvable:$true] %s1502_s9 }
 0x213   : > { %s1504_s14 = scalar_lea.hbm %s1503_s9, 16  ;;  %p1509_p0 = scmp.lt.s32.totalorder %s1503_s9, %s2002_s6 }
 0x214   : > { %p1505_p11 = scmp.ne.s32.totalorder %s1503_s9, %s1504_s14  ;;  %p1510_p1 = scmp.lt.s32.totalorder %s1508_s17, %s1504_s14 }
 0x216   : > { %p1506_p12 = pnand %p1505_p11, %p1634_p5  ;;  %p1511_p2 = por %p1510_p1, %p1509_p0 }
 0x217   : > { %1164 = vrot.lane.b32.xlu1 %v794_v51, %s1558_s20  ;;  %s1388_s20 = sshll.u32 %s243_s19, 4 }
 0x218   : > { %s245_s13 = scalar_lea.vmem [#allocation2], %s1388_s20  ;;  %p1507_p13 = pneg %p1506_p12 }
 0x219   : > { %s1322_s28 = sshll.u32 %s245_s13, 4  ;;  %s1323_s28 = int_to_ptr.vmem [resolvable:$true] %s1322_s28 }
 0x21a   : > { %p1512_p3 = pnand %p1511_p2, %p1507_p13 }
 0x228   : > { %v799_v5 = vpop.permute.xlu2 %798 }
 0x240   : > { %v957_v3 = vpop.permute.xlu0 %956 }
 0x241   : > { %v806_v52 = vpop.permute.xlu1 %805 }
 0x248   : > { %v1057_v22 = vpop.permute.xlu0 %1056 }
 0x249   : > { %v808_v53 = vpop.permute.xlu1 %807 }
 0x24a   : > { %v809_v54 = vsel %vm276_vm1, %v806_v52, %v808_v53  ;;  %v810_v55 = vsel %vm276_vm1, %v808_v53, %v806_v52  ;;  %v1161_v52 = vld [vmem:[%s2000_s4 + $0x38] sm:$0xff] }
 0x24b   : > { %v811_v56 = vmul.f32 %v810_v55, %v279_v10  ;;  %v812_v57 = vmul.f32 %v809_v54, %v280_v11 }
 0x24d   : > { %831 = vmatpush.msra.mxu2 %v811_v56  ;;  %851 = vmatpush.msra.mxu3 %v812_v57 }
 0x24e   : > { %1409 = vmatmul.msk.f32.vlgmr.msra.gmra.mxu2 %vm283_vm3, %v804_v58  ;;  %1410 = vmatmul.msk.f32.vlgmr.msra.gmra.mxu3 %vm283_vm3, %v804_v58 }
 0x250   : > { %v1163_v44 = vpop.permute.xlu0 %1162 }
 0x251   : > { %v901_v59 = vpop.permute.xlu1 %900 }
 0x259   : > { %v903_v60 = vpop.permute.xlu1 %902 }
 0x25a   : > { %v904_v61 = vsel %vm375_vm0, %v901_v59, %v903_v60  ;;  %v905_v10 = vsel %vm375_vm0, %v903_v60, %v901_v59 }
 0x25b   : > { %v906_v11 = vmul.f32 %v905_v10, %v378_v18  ;;  %v907_v2 = vmul.f32 %v904_v61, %v379_v19 }
 0x25d   : > { %926 = vmatpush.msrb.mxu2 %v906_v11  ;;  %946 = vmatpush.msrb.mxu3 %v907_v2 }
 0x25e   : > { %1413 = vmatmul.msk.f32.vlgmr.msrb.gmra.mxu2 %vm283_vm3, %v899_v4  ;;  %1414 = vmatmul.msk.f32.vlgmr.msrb.gmra.mxu3 %vm283_vm3, %v899_v4 }
 0x25f   : > { %1026 = vmatpush.msra.mxu2 %v793_v50  ;;  %1046 = vmatpush.msra.mxu3 %v794_v51 }
 0x261   : > { %v797_v7 = vpop.permute.xlu1 %796 }
 0x262   : > { %v800_v18 = vsel %vm264_vm2, %v797_v7, %v799_v5  ;;  %v801_v19 = vsel %vm264_vm2, %v799_v5, %v797_v7 }
 0x263   : > { %v802_v14 = vmul.f32 %v801_v19, %v267_v12  ;;  %v803_v15 = vmul.f32 %v800_v18, %v268_v13  ;;  %v1055_v12 = vpop.permute.xlu2 %1054 }
 0x264   : > { %v1058_v13 = vsel %vm535_vm6, %v1055_v12, %v1057_v22  ;;  %v1059_v23 = vsel %vm535_vm6, %v1057_v22, %v1055_v12 }
 0x265   : > { %874 = vmatpush.msrb.mxu0 %v802_v14  ;;  %894 = vmatpush.msrb.mxu1 %v803_v15  ;;  %v1060_v29 = vmul.f32 %v1058_v13, %v538_v48  ;;  %v1061_v30 = vmul.f32 %v1059_v23, %v539_v49  ;;  %v1053_v48 = vld [vmem:[%s2000_s4 + $0x28] sm:$0xff] }
 0x266   : > { %1411 = vmatmul.msk.f32.vlgmr.msrb.gmra.mxu0 %vm283_vm3, %v795_v16  ;;  %1412 = vmatmul.msk.f32.vlgmr.msrb.gmra.mxu1 %vm283_vm3, %v795_v16 }
 0x267   : > { %1417 = vmatmul.msk.f32.vlgmr.msra.gmra.mxu2 %vm283_vm3, %v1007_v17  ;;  %1418 = vmatmul.msk.f32.vlgmr.msra.gmra.mxu3 %vm283_vm3, %v1007_v17 }
 0x269   : > { %v955_v24 = vpop.permute.xlu1 %954 }
 0x26a   : > { %v958_v25 = vsel %vm432_vm4, %v955_v24, %v957_v3  ;;  %v959_v26 = vsel %vm432_vm4, %v957_v3, %v955_v24 }
 0x26b   : > { %v960_v27 = vmul.f32 %v959_v26, %v435_v33  ;;  %v961_v28 = vmul.f32 %v958_v25, %v436_v34  ;;  %v1269_v33 = vld [vmem:[%s2001_s5] sm:$0xff]  ;;  %v1219_v39 = vpop.permute.xlu2 %1218 }
 0x26c   : > { %1272 = vperm.xlu2 %1482, %v1269_v33  }
 0x26d   : > { %980 = vmatpush.msra.mxu0 %v960_v27  ;;  %1000 = vmatpush.msra.mxu1 %v961_v28 }
 0x26e   : > { %1415 = vmatmul.msk.f32.vlgmr.msra.gmra.mxu0 %vm283_vm3, %v953_v31  ;;  %1416 = vmatmul.msk.f32.vlgmr.msra.gmra.mxu1 %vm283_vm3, %v953_v31 }
 0x26f   : > { %1080 = vmatpush.msrb.mxu0 %v1060_v29  ;;  %1100 = vmatpush.msrb.mxu1 %v1061_v30 }
 0x271   : > { %v1109_v34 = vpop.permute.xlu1 %1108 }
 0x276   : > { %1419 = vmatmul.msk.f32.vlgmr.msrb.gmra.mxu0 %vm283_vm3, %v1053_v48  ;;  %1420 = vmatmul.msk.f32.vlgmr.msrb.gmra.mxu1 %vm283_vm3, %v1053_v48 }
 0x279   : > { %v1111_v49 = vpop.permute.xlu1 %1110 }
 0x27a   : > { %v1112_v32 = vsel %vm592_vm5, %v1109_v34, %v1111_v49  ;;  %v1113_v35 = vsel %vm592_vm5, %v1111_v49, %v1109_v34 }
 0x27b   : > { %v1114_v36 = vmul.f32 %v1112_v32, %v595_v45  ;;  %v1115_v37 = vmul.f32 %v1113_v35, %v596_v47 }
 0x27d   : > { %1134 = vmatpush.msrb.mxu2 %v1114_v36  ;;  %1154 = vmatpush.msrb.mxu3 %v1115_v37 }
 0x27e   : > { %1421 = vmatmul.msk.f32.vlgmr.msrb.gmra.mxu2 %vm283_vm3, %v1107_v38  ;;  %1422 = vmatmul.msk.f32.vlgmr.msrb.gmra.mxu3 %vm283_vm3, %v1107_v38 }
 0x281   : > { %v1217_v40 = vpop.permute.xlu1 %1216 }
 0x282   : > { %v1220_v41 = vsel %vm706_vm8, %v1217_v40, %v1219_v39  ;;  %v1221_v45 = vsel %vm706_vm8, %v1219_v39, %v1217_v40 }
 0x283   : > { %v1222_v47 = vmul.f32 %v1220_v41, %v709_v20  ;;  %v1223_v42 = vmul.f32 %v1221_v45, %v710_v21 }
 0x285   : > { %1242 = vmatpush.msra.mxu2 %v1222_v47  ;;  %1262 = vmatpush.msra.mxu3 %v1223_v42 }
 0x286   : > { %1425 = vmatmul.msk.f32.vlgmr.msra.gmra.mxu2 %vm283_vm3, %v1215_v43  ;;  %1426 = vmatmul.msk.f32.vlgmr.msra.gmra.mxu3 %vm283_vm3, %v1215_v43 }
 0x289   : > { %v1165_v46 = vpop.permute.xlu1 %1164 }
 0x28a   : > { %v1166_v50 = vsel %vm649_vm7, %v1163_v44, %v1165_v46  ;;  %v1167_v20 = vsel %vm649_vm7, %v1165_v46, %v1163_v44 }
 0x28b   : > { %v1168_v21 = vmul.f32 %v1166_v50, %v652_v62  ;;  %v1169_v51 = vmul.f32 %v1167_v20, %v653_v63 }
 0x28d   : > { %1188 = vmatpush.msra.mxu0 %v1168_v21  ;;  %1208 = vmatpush.msra.mxu1 %v1169_v51 }
 0x28e   : > { %1423 = vmatmul.msk.f32.vlgmr.msra.gmra.mxu0 %vm283_vm3, %v1161_v52  ;;  %1424 = vmatmul.msk.f32.vlgmr.msra.gmra.mxu1 %vm283_vm3, %v1161_v52 }
 0x2c6   : > { %v1273_v25 = vpop.permute.xlu2 %1272 }
 0x2d1   : > { %v833_v53 = vpop.f32.mrf.mxu2  ;;  %v853_v54 = vpop.f32.mrf.mxu3 }
 0x2e1   : > { %v928_v56 = vpop.f32.mrf.mxu2  ;;  %v948_v8 = vpop.f32.mrf.mxu3 }
 0x2e3   : > { %v876_v6 = vpop.f32.mrf.mxu0  ;;  %v896_v55 = vpop.f32.mrf.mxu1 }
 0x2e4   : > { %v877_v62 = vadd.f32 %v876_v6, %v833_v53  ;;  %v897_v57 = vadd.f32 %v896_v55, %v853_v54 }
 0x2e6   : > { %v951_v60 = vadd.f32 %v928_v56, %v877_v62  ;;  %v952_v61 = vadd.f32 %v948_v8, %v897_v57 }
 0x2ea   : > { %v1028_v58 = vpop.f32.mrf.mxu2  ;;  %v1048_v59 = vpop.f32.mrf.mxu3 }
 0x2eb   : > { %v982_v9 = vpop.f32.mrf.mxu0  ;;  %v1002_v63 = vpop.f32.mrf.mxu1 }
 0x2ec   : > { %v1005_v10 = vadd.f32 %v982_v9, %v951_v60  ;;  %v1006_v11 = vadd.f32 %v1002_v63, %v952_v61 }
 0x2ee   : > { %v1051_v7 = vadd.f32 %v1028_v58, %v1005_v10  ;;  %v1052_v18 = vadd.f32 %v1048_v59, %v1006_v11 }
 0x2f3   : > { %v1082_v4 = vpop.f32.mrf.mxu0  ;;  %v1102_v5 = vpop.f32.mrf.mxu1 }
 0x2f4   : > { %v1105_v19 = vadd.f32 %v1082_v4, %v1051_v7  ;;  %v1106_v14 = vadd.f32 %v1102_v5, %v1052_v18 }
 0x301   : > { %v1136_v2 = vpop.f32.mrf.mxu2  ;;  %v1156_v3 = vpop.f32.mrf.mxu3 }
 0x302   : > { %v1159_v15 = vadd.f32 %v1136_v2, %v1105_v19  ;;  %v1160_v16 = vadd.f32 %v1156_v3, %v1106_v14 }
 0x309   : > { %v1244_v17 = vpop.f32.mrf.mxu2  ;;  %v1264_v22 = vpop.f32.mrf.mxu3 }
 0x30b   : > { %v1190_v12 = vpop.f32.mrf.mxu0  ;;  %v1210_v13 = vpop.f32.mrf.mxu1 }
 0x30c   : > { %v1213_v23 = vadd.f32 %v1190_v12, %v1159_v15  ;;  %v1214_v24 = vadd.f32 %v1210_v13, %v1160_v16 }
 0x30e   : > { %v1267_v26 = vadd.f32 %v1244_v17, %v1213_v23  ;;  %v1268_v27 = vadd.f32 %v1264_v22, %v1214_v24 }
 0x310   : > { %v1275_v28 = vadd.f32 %v1273_v25, %v1267_v26  ;;  %v1276_v29 = vadd.f32 %v1273_v25, %v1268_v27 }
 0x312   : > { %v1277_v30 = vadd.f32 %v1276_v29, %v1275_v28  ;;  %v1281_v31 = vmul.f32 %v1275_v28, %v1275_v28  ;;  %v1282_v33 = vmul.f32 %v1276_v29, %v1276_v29 }
 0x314   : > { %1278 = vadd.xlane.f32.xlu0 %v1277_v30  ;;  %v1283_v34 = vadd.f32 %v1282_v33, %v1281_v31 }
 0x316   : > { %1284 = vadd.xlane.f32.xlu1 %v1283_v34 }
 0x387   : > { %v1279_v48 = vpop.xlane.xlu0 %1278 }
 0x388   : > { %v1280_v49 = vmul.f32 0.00390625, %v1279_v48 }
 0x389   : > { %v1285_v32 = vpop.xlane.xlu1 %1284 }
 0x38a   : > { %v1286_v35 = vmul.f32 0.00390625, %v1285_v32  ;;  %v1287_v36 = vmul.f32 %v1280_v49, %v1280_v49  ;;  %v1289_v43 = vsub.f32 %v1275_v28, %v1280_v49  ;;  %v1290_v44 = vsub.f32 %v1276_v29, %v1280_v49 }
 0x38c   : > { %v1288_v37 = vsub.f32 %v1286_v35, %v1287_v36 }
 0x38e   : > { %v1291_v38 = vadd.f32 1e-05, %v1288_v37 }
 0x390   : > { %1486 = vrsqrt.f32 %v1291_v38  ;;  %vm1298_vm13 = vweird.f32 %v1291_v38 }
 0x396   : > { %v1487_v39 = vpop.eup %1486 }
 0x397   : > { %v1293_v40 = vmul.f32 %v1487_v39, %v1291_v38  ;;  %vm1299_vm12 = vweird.f32 %v1487_v39 }
 0x398   : > { %vm1300_vm14 = vmor %vm1298_vm13, %vm1299_vm12 }
 0x399   : > { %v1294_v41 = vmul.f32 %v1487_v39, %v1293_v40 }
 0x39b   : > { %v1295_v45 = vmul.f32 0.5, %v1294_v41 }
 0x39d   : > { %v1296_v47 = vsub.f32 1.5, %v1295_v45 }
 0x39f   : > { %v1297_v42 = vmul.f32 %v1487_v39, %v1296_v47 }
 0x3a1   : > { %v1301_v46 = vsel %vm1300_vm14, %v1487_v39, %v1297_v42 }
 0x3a2   : > { %v1302_v50 = vmul.f32 %v1301_v46, %v1289_v43  ;;  %v1303_v20 = vmul.f32 %v1301_v46, %v1290_v44 }
 0x3a4   : > { %v1304_v21 = vadd.f32 %v1302_v50, %v1648_v0  ;;  %v1305_v51 = vadd.f32 %v1303_v20, %v1656_v1 }
 0x3a6   : > { %1306 = vst [vmem:[%s245_s13] sm:$0xff] %v1304_v21 }
 0x3a7   : > { %1307 = vst [vmem:[%s245_s13 + $0x8] sm:$0xff] %v1305_v51 }
 0x3a8   : > { %1515 = shalt.err (!%p1512_p3)
}
 0x3a9   : > { %1433 = dma.vmem_to_hbm [thread:$0]  (%p1634_p5), %s1323_s28, 256, %s1325_s29, %s1309_s25  }
 0x3aa PF: > { %p1439_p4 = scmp.ge.s32.totalorder %s1550_s24, 2  ;;  %s1336_s19 = sand.u32 1, %s1538_s21  }
 0x3ab   : > { %s1337_s26 = scalar_lea.sflag [#allocation3], %s1336_s19 }
 0x3ac   : > { %p1436_p7 = pnand %p1439_p4, %p1638_p6 }
 0x3ae   : > { %p1437_p8 = pneg %p1436_p7 }
 0x3b0   : > { %1533 = dma.done.wait (%p1437_p8), %s1337_s26, 256  }
 0x3b1   : > { %1535 = vsyncadd (%p1437_p8), %s1337_s26, 4294967040  ;;  %p16_p9 = scmp.ge.s32.totalorder %s1621_s27, 4   ;;  %s2005_s21 = smov %s1542_s22 }
 0x3b2   : > { %s2006_s22 = smov %s1546_s23  ;;  %s2007_s23 = smov %s1632_s30 }
 0x3b3   : > { %s2008_s24 = smov %s1621_s27  ;;  %18 = sbr.rel (!%p16_p9) target bundleno = 3 (0x3), region = 79 }
 0x3b8   :  { %1343 = vsyncpa [#allocation3], 1 }
 0x3b9   :  { %1345 = vsyncpa [#allocation3 + $0x1], 1 }

</bundles_post_ra>
